<compile_context>
chip_gen: v7x
topology: tpu7x:2x2x1
jax: 0.10.0
libtpu: 0.0.40
codegen_flags: <defaults>
</compile_context>

<pallas_src>
import math

import jax
import jax.numpy as jnp
from jax.experimental import pallas as pl
from jax.experimental.pallas import tpu as pltpu


_LANES = 512          # lane-dense last dim: multiple of 128 -> unmasked vld/vst
_CHUNK_1D = 32 * 1024  # misaligned fallback: 1-D chunk, multiple of 8*128


def _copy_kernel(x_ref, o_ref):
    # Elementwise identity: copy the whole VMEM tile.  Interior tiles are
    # lane-dense (unmasked stores); Pallas masks a partial boundary tile.
    o_ref[...] = x_ref[...]


def _chip_tuning():
    """Per-chip (tile_bytes, vmem_limit_bytes) for the lane-dense copy path."""
    try:
        kind = jax.devices()[0].device_kind.lower().replace(" ", "")
    except Exception:  # pragma: no cover - no device visible at trace time
        kind = ""
    if "v5lite" in kind or "v5e" in kind:
        # v5e: scoped-VMEM default is only 16 MiB; 4 MiB tiles double-buffered
        # (in+out) need 16 MiB, so raise the limit (128 MiB physical).
        return 4 * 1024 * 1024, 64 * 1024 * 1024
    if "v6" in kind:
        # v6e: 4 MiB tiles -> 16 MiB double-buffered, under the 32 MiB default.
        return 4 * 1024 * 1024, None
    if "v7" in kind or "7x" in kind:
        # v7x: 8 MiB tiles need ~32 MiB; raise limit but stay well under the
        # 64 MiB physical VMEM per TensorCore.
        return 8 * 1024 * 1024, 48 * 1024 * 1024
    # Unknown chip: 2 MiB tiles fit under every default scoped-VMEM limit.
    return 2 * 1024 * 1024, None


def _feat_mask_forward_impl(x):
    """FeatMask.forward (identity) as a single-pass Pallas copy."""
    orig_shape = x.shape
    total = math.prod(orig_shape) if orig_shape else 1
    if total == 0:
        # Zero-size guard (review correctness concern): nothing to copy.
        return x

    itemsize = jnp.dtype(x.dtype).itemsize
    tile_bytes, vmem_limit = _chip_tuning()
    cost = pl.CostEstimate(
        flops=0, transcendentals=0, bytes_accessed=2 * total * itemsize
    )

    if total % _LANES == 0:
        # ---- Fast path: reshape to (rows, 512) is a free bitcast -----------
        rows = total // _LANES
        # Sublane pack minimum: 8 (f32), 16 (bf16/f16), 32 (int8/fp8).
        # TODO(synk): sub-byte dtypes (int4/fp4) need a larger pack minimum.
        pack = 8 * max(1, 4 // itemsize)

        tm = max(pack, (tile_bytes // (_LANES * itemsize)) // pack * pack)
        if rows <= tm:
            if rows >= 2 * pack:
                # Split into >= 2 tiles: enables DMA/copy overlap and gives
                # both v7x TensorCores work; ~0.35 us/step overhead is cheap.
                half = (rows + 1) // 2
                tm = min(rows, ((half + pack - 1) // pack) * pack)
            else:
                tm = rows  # full-extent block (legal for any row count)
        grid = (pl.cdiv(rows, tm),)  # boundary block (if any) is masked

        x2d = x.reshape(rows, _LANES)  # free bitcast, no pad
        out2d = pl.pallas_call(
            _copy_kernel,
            out_shape=jax.ShapeDtypeStruct((rows, _LANES), x.dtype),
            grid=grid,
            # Deeper buffering (pipeline_mode=pl.Buffered(3)) is a possible
            # single-digit-% knob for this pure-copy body; left at default 2.
            in_specs=[pl.BlockSpec((tm, _LANES), lambda i: (i, 0))],
            out_specs=pl.BlockSpec((tm, _LANES), lambda i: (i, 0)),
            compiler_params=pltpu.CompilerParams(
                dimension_semantics=("parallel",),
                vmem_limit_bytes=vmem_limit,
            ),
            cost_estimate=cost,
        )(x2d)
        return out2d.reshape(orig_shape)

    # ---- Misaligned path: 1-D chunked copy, still one read + one write -----
    # No whole-tensor pad / tail slice: the cdiv grid lets Pallas mask the
    # final partial chunk instead.
    flat = x.reshape(total)
    if total <= _CHUNK_1D:
        blk, grid = (total,), (1,)          # full-extent block (any size legal)
    else:
        blk, grid = (_CHUNK_1D,), (pl.cdiv(total, _CHUNK_1D),)
    out = pl.pallas_call(
        _copy_kernel,
        out_shape=jax.ShapeDtypeStruct((total,), x.dtype),
        grid=grid,
        in_specs=[pl.BlockSpec(blk, lambda i: (i,))],
        out_specs=pl.BlockSpec(blk, lambda i: (i,)),
        compiler_params=pltpu.CompilerParams(
            dimension_semantics=("parallel",),
        ),
        cost_estimate=cost,
    )(flat)
    return out.reshape(orig_shape)


# jit so the (rows, 512) slab is a pure bitcast intermediate and the whole
# forward stays a single fused HBM read + write.
feat_mask_forward = jax.jit(_feat_mask_forward_impl)


if __name__ == "__main__":
    key = jax.random.PRNGKey(0)
    # Small NCHW input consistent with the (shape-agnostic) forward.
    x = jax.random.normal(key, (2, 4, 16, 16), dtype=jnp.float32)

    y = jax.block_until_ready(feat_mask_forward(x))

    assert y.shape == x.shape
    assert y.dtype == x.dtype
    assert bool(jnp.array_equal(y, x))

    print("KERNEL_OK")
</pallas_src>

<mosaic_0001>
module attributes {stable_mosaic.version = 11 : i64} {
  func.func @_copy_kernel(%arg0: i32, %arg1: memref<4x512xf32, #tpu.memory_space<vmem>>, %arg2: memref<4x512xf32, #tpu.memory_space<vmem>>) attributes {dimension_semantics = [#tpu.dimension_semantics<parallel>], iteration_bounds = array<i64: 1>, scalar_prefetch = 0 : i64, scratch_operands = 0 : i64, tpu.core_type = #tpu.core_type<tc>, window_params = [{transform_indices = @transform_0, window_bounds = array<i64: 4, 512>}, {transform_indices = @transform_1, window_bounds = array<i64: 4, 512>}]} {
    %c0 = arith.constant 0 : index
    %c0_0 = arith.constant 0 : index
    %0 = vector.load %arg1[%c0, %c0_0] : memref<4x512xf32, #tpu.memory_space<vmem>>, vector<4x512xf32>
    %c0_1 = arith.constant 0 : index
    %c0_2 = arith.constant 0 : index
    %1 = vector.load %arg2[%c0_1, %c0_2] : memref<4x512xf32, #tpu.memory_space<vmem>>, vector<4x512xf32>
    tpu.vector_store %arg2[%c0_1, %c0_2], %0 {strides = array<i32>} : memref<4x512xf32, #tpu.memory_space<vmem>>, vector<4x512xf32>,
    return
  }
  func.func @transform_0(%arg0: i32) -> (i32, i32) {
    %c0_i32 = arith.constant 0 : i32
    %c0_i32_0 = arith.constant 0 : i32
    return %arg0, %c0_i32 : i32, i32
  }
  func.func @transform_1(%arg0: i32) -> (i32, i32) {
    %c0_i32 = arith.constant 0 : i32
    %c0_i32_0 = arith.constant 0 : i32
    return %arg0, %c0_i32 : i32, i32
  }
}

</mosaic_0001>

<bundles_post_ra>
// kernel: _feat_mask_forward_impl.1
= control target key start
LH: loop header
LB: loop body
LE: loop exit
PB: predicated region body
PF: predicated region fallthrough
CT: control target
= control target key end

     0   :  { %s38_s0 = inlined_call_operand.vmem [shape: f32[4,512], index: 0, kind: input, shape index: {}]   ;;  %s39_s1 = inlined_call_operand.vmem [shape: f32[4,512], index: 1, kind: output, shape index: {}]  }
   0x1   :  { %v8_v0 = vld [vmem:[%s38_s0] sm:$0xff]  ;;  %v9_v1 = vld [vmem:[%s38_s0 + $0x8] sm:$0xff] }
   0x2   :  { %10 = vst [vmem:[%s39_s1] sm:$0xff] %v8_v0  ;;  %11 = vst [vmem:[%s39_s1 + $0x8] sm:$0xff] %v9_v1 }

</bundles_post_ra>
